<compile_context>
chip_gen: v6e
topology: v6e:2x2x1
jax: 0.10.0
libtpu: 0.0.40
codegen_flags: <defaults>
</compile_context>

<pallas_src>
import numpy as np
import jax
import jax.numpy as jnp
from jax.experimental import pallas as pl
from jax.experimental.pallas import tpu as pltpu


def _round_up(a: int, b: int) -> int:
    return -(-a // b) * b


def _readout_kernel_vpu(x_ref, w_ref, o_ref):
    # Small out_dim: VPU broadcast-multiply + lane reduce per output column.
    # Multiply in x's native dtype (bf16 fast path on v6e/v7x), accumulate in f32.
    x = x_ref[...]                                      # [TM, cols]
    out_dim = o_ref.shape[-1]
    outs = []
    for j in range(out_dim):                            # static unroll (out_dim small)
        wj = w_ref[j:j + 1, :]                          # [1, cols]
        outs.append(jnp.sum(x * wj, axis=-1, keepdims=True, dtype=jnp.float32))
    o_ref[...] = outs[0] if out_dim == 1 else jnp.concatenate(outs, axis=-1)


def _readout_kernel_mxu(x_ref, w_ref, o_ref):
    # Wide-output case: one MXU matmul per node tile, f32 accumulation.
    o_ref[...] = jnp.dot(x_ref[...], w_ref[...], preferred_element_type=jnp.float32)


def linear_readout_block(
    x: jax.Array,
    weight: jax.Array,
    *,
    active_in_dim: int | None = None,
    block_bytes: int = 4 * 1024 * 1024,
    vpu_max_out_dim: int = 8,
) -> jax.Array:
    """Equivalent of LinearReadoutBlock.forward.

    x:      [n_nodes, in_dim]   node features
    weight: [out_dim, in_dim]   dense weight (e3nn normalization folded in),
                                or [in_dim] for a single scalar readout
    active_in_dim: if the nonzero weight columns are a contiguous prefix of width
                   `active_in_dim`, only that slab of x is streamed (applied only
                   when it is a multiple of 128, per TPU lane tiling).
    returns [n_nodes, out_dim] float32
    """
    w = jnp.atleast_2d(weight)
    out_dim, in_dim = w.shape
    n_nodes = x.shape[0]
    assert x.shape[1] == in_dim, "feature dim of x must match weight"

    # Structural 0e sparsity: stream only the active prefix of the feature axis.
    cols = in_dim
    if active_in_dim is not None and 0 < active_in_dim < in_dim and active_in_dim % 128 == 0:
        cols = active_in_dim
        w = w[:, :cols]                                  # tiny; done once in the wrapper

    itemsize = x.dtype.itemsize
    # Node-axis tile: byte-budgeted (HBM streaming efficiency), multiple of 8,
    # capped so the parallel grid axis has >= ~4 steps (v7x megacore split).
    rows_from_budget = max(8, (block_bytes // max(1, cols * itemsize)) // 8 * 8)
    rows_for_split = _round_up(pl.cdiv(n_nodes, 4), 8)
    tm = max(8, min(rows_from_budget, rows_for_split))
    grid = (pl.cdiv(n_nodes, tm),)

    cost = pl.CostEstimate(
        flops=2 * n_nodes * cols * out_dim,
        transcendentals=0,
        bytes_accessed=n_nodes * cols * itemsize
        + out_dim * cols * itemsize
        + n_nodes * out_dim * 4,
    )
    compiler_params = pltpu.CompilerParams(dimension_semantics=("parallel",))

    x_spec = pl.BlockSpec((tm, cols), lambda i: (i, 0))            # streamed node tiles
    out_spec = pl.BlockSpec((tm, out_dim), lambda i: (i, 0))

    if out_dim <= vpu_max_out_dim:
        # Cast the (tiny) weight to x.dtype so the elementwise multiply runs in the
        # input dtype (no [tm, cols] f32 temp).  Reduce accumulates in f32.
        w_in = w.astype(x.dtype)                                   # [out_dim, cols]
        out = pl.pallas_call(
            _readout_kernel_vpu,
            out_shape=jax.ShapeDtypeStruct((n_nodes, out_dim), jnp.float32),
            grid=grid,
            in_specs=[x_spec, pl.BlockSpec((out_dim, cols), lambda i: (0, 0))],
            out_specs=out_spec,
            compiler_params=compiler_params,
            cost_estimate=cost,
        )(x, w_in)
    else:
        w_t = w.T.astype(x.dtype)                                  # [cols, out_dim]
        out = pl.pallas_call(
            _readout_kernel_mxu,
            out_shape=jax.ShapeDtypeStruct((n_nodes, out_dim), jnp.float32),
            grid=grid,
            in_specs=[x_spec, pl.BlockSpec((cols, out_dim), lambda i: (0, 0))],
            out_specs=out_spec,
            compiler_params=compiler_params,
            cost_estimate=cost,
        )(x, w_t)

    return out


if __name__ == "__main__":
    key = jax.random.PRNGKey(0)
    kx, kw, kw2, kx2, kw3 = jax.random.split(key, 5)

    # MACE-ish shapes: irreps_in ~ "8x0e + 8x1o" -> in_dim = 8 + 8*3 = 32, readout '0e'.
    n_nodes, n_scalar, in_dim = 16, 8, 32
    x = jax.random.normal(kx, (n_nodes, in_dim), dtype=jnp.float32)

    # e3nn Linear to '0e' only connects 0e->0e: non-scalar channels get zero weight.
    w_scalar = jax.random.normal(kw, (1, n_scalar), dtype=jnp.float32)
    weight = jnp.concatenate(
        [w_scalar, jnp.zeros((1, in_dim - n_scalar), dtype=jnp.float32)], axis=1
    )  # [1, in_dim]

    out = jax.block_until_ready(linear_readout_block(x, weight))
    ref = x @ weight.T
    assert out.shape == (n_nodes, 1)
    np.testing.assert_allclose(np.asarray(out), np.asarray(ref), rtol=1e-5, atol=1e-5)

    # Ragged node count (13 rows, tm=8 -> partial last block, no wrapper padding).
    x_r = x[:13]
    out_r = jax.block_until_ready(linear_readout_block(x_r, weight))
    np.testing.assert_allclose(
        np.asarray(out_r), np.asarray(x_r @ weight.T), rtol=1e-5, atol=1e-5
    )

    # Small multi-output readout: stays on the VPU path.
    weight2 = jax.random.normal(kw2, (2, in_dim), dtype=jnp.float32)
    out2 = jax.block_until_ready(linear_readout_block(x, weight2))
    np.testing.assert_allclose(
        np.asarray(out2), np.asarray(x @ weight2.T), rtol=1e-5, atol=1e-5
    )

    # Same weight forced down the MXU path (exercise both kernels).
    out2m = jax.block_until_ready(linear_readout_block(x, weight2, vpu_max_out_dim=1))
    np.testing.assert_allclose(
        np.asarray(out2m), np.asarray(x @ weight2.T), rtol=1e-5, atol=1e-5
    )

    # 0e-prefix sparsity: only the first 128 of 256 features carry weight; stream 128.
    in_dim2, n_active = 256, 128
    x2 = jax.random.normal(kx2, (n_nodes, in_dim2), dtype=jnp.float32)
    w_act = jax.random.normal(kw3, (1, n_active), dtype=jnp.float32)
    weight3 = jnp.concatenate(
        [w_act, jnp.zeros((1, in_dim2 - n_active), dtype=jnp.float32)], axis=1
    )
    out3 = jax.block_until_ready(linear_readout_block(x2, weight3, active_in_dim=n_active))
    np.testing.assert_allclose(
        np.asarray(out3), np.asarray(x2 @ weight3.T), rtol=1e-5, atol=1e-5
    )

    print("KERNEL_OK")
</pallas_src>

<mosaic_0001>
module attributes {stable_mosaic.version = 11 : i64} {
  func.func @_readout_kernel_vpu(%arg0: i32, %arg1: memref<8x32xf32, #tpu.memory_space<vmem>>, %arg2: memref<1x32xf32, #tpu.memory_space<vmem>>, %arg3: memref<8x1xf32, #tpu.memory_space<vmem>>) attributes {dimension_semantics = [#tpu.dimension_semantics<parallel>], iteration_bounds = array<i64: 2>, scalar_prefetch = 0 : i64, scratch_operands = 0 : i64, tpu.core_type = #tpu.core_type<tc>, window_params = [{transform_indices = @transform_0, window_bounds = array<i64: 8, 32>}, {pipeline_mode = #tpu.pipeline_mode<synchronous>, transform_indices = @transform_1, window_bounds = array<i64: 1, 32>}, {transform_indices = @transform_2, window_bounds = array<i64: 8, 1>}]} {
    %c0 = arith.constant 0 : index
    %c0_0 = arith.constant 0 : index
    %0 = vector.load %arg1[%c0, %c0_0] : memref<8x32xf32, #tpu.memory_space<vmem>>, vector<8x32xf32>
    %c0_1 = arith.constant 0 : index
    %c0_2 = arith.constant 0 : index
    %1 = vector.load %arg2[%c0_1, %c0_2] : memref<1x32xf32, #tpu.memory_space<vmem>>, vector<1x32xf32>
    %2 = vector.broadcast %1 : vector<1x32xf32> to vector<8x32xf32>
    %3 = arith.mulf %0, %2 : vector<8x32xf32>
    %cst = arith.constant dense<0.000000e+00> : vector<8xf32>
    %4 = vector.multi_reduction <add>, %3, %cst [1] : vector<8x32xf32> to vector<8xf32>
    %5 = vector.shape_cast %4 : vector<8xf32> to vector<8x1xf32>
    %c0_3 = arith.constant 0 : index
    %c0_4 = arith.constant 0 : index
    %6 = vector.load %arg3[%c0_3, %c0_4] : memref<8x1xf32, #tpu.memory_space<vmem>>, vector<8x1xf32>
    tpu.vector_store %arg3[%c0_3, %c0_4], %5 {strides = array<i32>} : memref<8x1xf32, #tpu.memory_space<vmem>>, vector<8x1xf32>,
    return
  }
  func.func @transform_0(%arg0: i32) -> (i32, i32) {
    %c0_i32 = arith.constant 0 : i32
    %c0_i32_0 = arith.constant 0 : i32
    return %arg0, %c0_i32 : i32, i32
  }
  func.func @transform_1(%arg0: i32) -> (i32, i32) {
    %c0_i32 = arith.constant 0 : i32
    %c0_i32_0 = arith.constant 0 : i32
    %c0_i32_1 = arith.constant 0 : i32
    return %c0_i32, %c0_i32_0 : i32, i32
  }
  func.func @transform_2(%arg0: i32) -> (i32, i32) {
    %c0_i32 = arith.constant 0 : i32
    %c0_i32_0 = arith.constant 0 : i32
    return %arg0, %c0_i32 : i32, i32
  }
}

</mosaic_0001>

<bundles_post_ra>
// kernel: tpu_custom_call.1
= control target key start
LH: loop header
LB: loop body
LE: loop exit
PB: predicated region body
PF: predicated region fallthrough
CT: control target
= control target key end

     0   :  { %7 = vsyncpa [#allocation3], 0  ;;  %s472_s0 = inlined_call_operand.hbm [shape: f32[16,32], index: 0, kind: input, shape index: {}]   ;;  %s473_s1 = inlined_call_operand.vmem [shape: f32[1,32], index: 1, kind: input, shape index: {}]   ;;  %s474_s2 = inlined_call_operand.vmem [shape: f32[16,1], index: 2, kind: output, shape index: {}]  }
   0x1   :  { %9 = vsyncpa [#allocation3 + $0x1], 0  ;;  %s369_s9 = smov 0   ;;  %s371_s10 = smov 0  }
   0x2   :  { %s373_s11 = smov 0   ;;  %s375_s12 = smov 0  }
   0x3 LB: > { %s388_s13 = sadd.s32 4294967295, %s351_s12   ;;  %s391_s14 = sadd.s32 1, %s351_s12   ;;  %s351_s12 = sphi %s375_s12, %s484_s12   ;;  %s347_s11 = sphi %s373_s11, %s483_s11   ;;  %s343_s10 = sphi %s371_s10, %s482_s10   ;;  %s339_s9 = sphi %s369_s9, %s481_s9  }
   0x4   : > { %s19_s15 = ssub.s32 %s351_s12, %s391_s14  ;;  %s22_s16 = sadd.s32 1, %s347_s11 }
   0x5   : > { %p20_p0 = scmp.eq.s32.totalorder %s19_s15, 0  ;;  %p29_p1 = scmp.ne.s32.totalorder %s347_s11, %s343_s10 }
   0x6   : > { %p30_p2 = scmp.eq.s32.totalorder %s351_s12, 0  ;;  %p35_p3 = scmp.ne.s32.totalorder %s343_s10, %s339_s9 }
   0x7   : > { %s401_s17 = scalar_select %p20_p0, %s347_s11, %s22_s16  }
   0x8   : > { %p31_p4 = por %p30_p2, %p29_p1  ;;  %p36_p5 = scmp.eq.s32.totalorder %s388_s13, 0 }
   0x9   : > { %p256_p6 = scmp.lt.s32.totalorder %s351_s12, 2  ;;  %s109_s19 = sand.u32 1, %s347_s11  }
   0xa   : > { %p405_p7 = por %p36_p5, %p35_p3  ;;  %s242_s20 = sshll.u32 %s109_s19, 3 }
   0xb   : > { %s243_s21 = sshll.u32 %s351_s12, 7  ;;  %s113_s25 = scalar_lea.vmem [#allocation2], %s242_s20 }
   0xc   : > { %s476_s18 = scalar_select %p405_p7, 1, 0 }
   0xd   : > { %s414_s24 = scalar_lea.hbm %s472_s0, %s243_s21  ;;  %s120_s26 = sshll.u32 %s113_s25, 4  ;;  %s416_s26 = int_to_ptr.vmem [resolvable:$true] %s120_s26 }
   0xe   : > { %p418_p8 = pnand %p256_p6, %p31_p4  ;;  %s110_s28 = scalar_lea.sflag [#allocation3], %s109_s19 }
   0xf   : > { %s289_s29 = scalar_lea.hbm %s414_s24, 128  ;;  %s294_s4 = scalar_lea.hbm %s472_s0, 256 }
  0x10   : > { %p290_p11 = scmp.ne.s32.totalorder %s414_s24, %s289_s29  ;;  %p291_p12 = pneg %p418_p8 }
  0x11   : > { %p295_p1 = scmp.lt.s32.totalorder %s414_s24, %s472_s0  ;;  %p296_p2 = scmp.lt.s32.totalorder %s294_s4, %s289_s29 }
  0x12   : > { %p292_p13 = pnand %p291_p12, %p290_p11 }
  0x13   : > { %p297_p3 = por %p296_p2, %p295_p1 }
  0x14   : > { %p293_p0 = pneg %p292_p13 }
  0x16   : > { %p298_p4 = pnand %p297_p3, %p293_p0 }
  0x18   : > { %301 = shalt.err (!%p298_p4)
}
  0x19   : > { %s302_s7 = scalar_lea.vmem %s416_s26, 128  ;;  %s353_s8 = smov [#allocation2]  }
  0x1a   : > { %p303_p5 = scmp.ne.s32.totalorder %s416_s26, %s302_s7  ;;  %s307_s9 = sshll.u32 %s353_s8, 4  ;;  %s308_s9 = int_to_ptr.vmem [resolvable:$false] %s307_s9 }
  0x1b   : > { %s309_s15 = scalar_lea.vmem %s308_s9, 256  ;;  %p310_p13 = scmp.lt.s32.totalorder %s416_s26, %s308_s9 }
  0x1c   : > { %p305_p6 = pnand %p303_p5, %p291_p12  ;;  %p311_p9 = scmp.lt.s32.totalorder %s309_s15, %s302_s7 }
  0x1e   : > { %p306_p11 = pneg %p305_p6  ;;  %p312_p10 = por %p311_p9, %p310_p13 }
  0x20   : > { %p313_p7 = pnand %p312_p10, %p306_p11 }
  0x22   : > { %316 = shalt.err (!%p313_p7)
}
  0x23   : > { %255 = dma.hbm_to_vmem [thread:$0]  (!%p418_p8), %s414_s24, 128, %s416_s26, %s110_s28  }
  0x24   : > { %p478_p0 = scmp.lt.s32.totalorder %s351_s12, 3  ;;  %p479_p1 = scmp.ge.s32.totalorder %s351_s12, 1 }
  0x26   : > { %p126_p12 = pnand %p479_p1, %p478_p0 }
  0x27   : > { %s131_s16 = sand.u32 (!%p126_p12), 1, %s343_s10   ;;  %p480_p9 = scmp.ne.s32.totalorder (!%p126_p12), %s476_s18, 0 }
  0x28   : > { %129 = sbr.rel (%p126_p12) target bundleno = 190 (0xbe), region = 28  ;;  %s245_s19 = sshll.u32 (!%p126_p12), %s131_s16, 3 }
  0x29   : > { %s132_s20 = scalar_lea.sflag (!%p126_p12), [#allocation3], %s131_s16  ;;  %s135_s21 = scalar_lea.vmem (!%p126_p12), [#allocation2], %s245_s19 }
  0x2d   : > { %334 = dma.done.wait (%p480_p9), %s132_s20, 128  }
  0x2e   : > { %336 = vsyncadd (%p480_p9), %s132_s20, 4294967168  ;;  %v159_v0 = vld [vmem:[%s135_s21] sm:$0xff]  ;;  %vm168_vm0 = vcmask 261120   ;;  %p155_p7 = scmp.lt.s32.totalorder %s388_s13, 1  ;;  %vm172_vm1 = vcmask 7168  }
  0x2f   : > { %v247_v1 = vld [vmem:[%s473_s1] ss:$0 sm:$0xff] }
  0x30   : > { %v167_v2 = vmul.f32 %v247_v1, %v159_v0  ;;  %s486_s13 = smov (!%p155_p7, %s388_s13), 1 }
  0x31   : > { %s246_s12 = sshll.u32 %s486_s13, 3 }
  0x32   : > { %v169_v3 = vsel %vm168_vm0, %v167_v2, 0.0  ;;  %s158_s26 = scalar_lea.vmem %s474_s2, %s246_s12 }
  0x33   : > { %170 = vadd.xlane.f32.xlu0 %v169_v3 }
  0xbc   : > { %v171_v4 = vpop.xlane.xlu0 %170 }
  0xbd   : > { %173 = vst.msk [vmem:[%s158_s26] sm:$0xff] %vm172_vm1, %v171_v4 }
  0xbe PF: > { %p12_p8 = scmp.ge.s32.totalorder %s391_s14, 4   ;;  %s481_s9 = smov %s343_s10 }
  0xbf   : > { %s482_s10 = smov %s347_s11  ;;  %s483_s11 = smov %s401_s17 }
  0xc0   : > { %s484_s12 = smov %s391_s14  ;;  %14 = sbr.rel (!%p12_p8) target bundleno = 3 (0x3), region = 68 }
  0xc5   :  { %193 = vsyncpa [#allocation3], 1 }
  0xc6   :  { %195 = vsyncpa [#allocation3 + $0x1], 1 }

</bundles_post_ra>
